<compile_context>
chip_gen: v7x
topology: tpu7x:2x2x1
jax: 0.10.0
libtpu: 0.0.40
codegen_flags: <defaults>
</compile_context>

<pallas_src>
import functools

import jax
import jax.numpy as jnp
import numpy as np
from jax.experimental import pallas as pl
from jax.experimental.pallas import tpu as pltpu


def _interp_matrix(out_size: int, in_size: int) -> jax.Array:
    """1-D bilinear interpolation matrix (f32), PyTorch align_corners=False."""
    i = jnp.arange(out_size, dtype=jnp.float32)
    scale = in_size / out_size
    src = (i + 0.5) * scale - 0.5
    src = jnp.maximum(src, 0.0)                 # PyTorch clamps negative src to 0
    i0 = jnp.floor(src).astype(jnp.int32)
    i0 = jnp.minimum(i0, in_size - 1)
    i1 = jnp.minimum(i0 + 1, in_size - 1)
    w1 = src - i0.astype(jnp.float32)
    w0 = 1.0 - w1
    return (jax.nn.one_hot(i0, in_size, dtype=jnp.float32) * w0[:, None]
            + jax.nn.one_hot(i1, in_size, dtype=jnp.float32) * w1[:, None])


def _pick_block_channels(P, H_in, W_in, H_out, W_out, itemsize):
    """Number of (n, c) images per grid step, sized for VMEM and megacore."""
    lane = 128

    def padded(h, w, isz):                      # lane-padded VMEM bytes of an (h, w) tile
        return h * max(w, lane) * isz

    # double-buffered input/output blocks (data dtype) + f32 temporaries per image
    per_img = 2 * (padded(H_in, W_in, itemsize) + padded(H_out, W_out, itemsize))
    per_img += (padded(H_in, W_in, 4) + padded(H_in, W_out, 4)
                + padded(H_out, W_out, 4) + padded(H_out, H_in, 4))
    budget = 8 * 1024 * 1024                    # well inside 32 MiB scoped / 64 MiB v7x VMEM
    tc = max(1, min(P, budget // max(per_img, 1), 64))
    # keep >= 2 grid steps when possible so both v7x TensorCores are used
    while tc > 1 and pl.cdiv(P, tc) < 2:
        tc = max(1, tc // 2)
    return tc


@functools.partial(jax.jit, static_argnames=("size",))
def interpolate_bilinear(x, size):
    """x: (N, C, H_in, W_in).  Equivalent to
    F.interpolate(x, size=size, mode='bilinear', align_corners=False)."""
    N, C, H_in, W_in = x.shape
    H_out, W_out = size
    P = N * C

    wy = _interp_matrix(H_out, H_in)            # (H_out, H_in)  f32
    wxT = _interp_matrix(W_out, W_in).T         # (W_in,  W_out) f32

    tc = _pick_block_channels(P, H_in, W_in, H_out, W_out, x.dtype.itemsize)
    n_blocks = pl.cdiv(P, tc)
    P_pad = n_blocks * tc

    x3 = x.reshape(P, H_in, W_in)
    if P_pad != P:
        x3 = jnp.pad(x3, ((0, P_pad - P), (0, 0), (0, 0)))

    def kernel(x_ref, wxT_ref, wy_ref, o_ref):
        # x_ref : (tc, H_in, W_in)   wxT_ref : (W_in, W_out)
        # wy_ref: (H_out, H_in)      o_ref   : (tc, H_out, W_out)
        xb = x_ref[...].astype(jnp.float32).reshape(tc * H_in, W_in)
        # W-interp: one flat GEMM, channel block folded into M (M = tc*H_in)
        t = jnp.dot(xb, wxT_ref[...], preferred_element_type=jnp.float32)   # (tc*H_in, W_out)
        t3 = t.reshape(tc, H_in, W_out)
        # H-interp: single batched MXU matmul over the channel block
        wy_b = jnp.broadcast_to(wy_ref[...], (tc, H_out, H_in))
        o3 = jnp.einsum("boh,bhw->bow", wy_b, t3,
                        preferred_element_type=jnp.float32)                 # (tc, H_out, W_out)
        o_ref[...] = o3.astype(o_ref.dtype)

    # TODO(synk): for W_out < 128 a channels-in-lanes (channels-last) blocking would make
    # stores fully lane-dense; for very large H_out/W_out, tile Wy/WxT with extra grid axes.
    out = pl.pallas_call(
        kernel,
        out_shape=jax.ShapeDtypeStruct((P_pad, H_out, W_out), x.dtype),
        grid_spec=pltpu.PrefetchScalarGridSpec(
            num_scalar_prefetch=0,
            grid=(n_blocks,),
            in_specs=[
                pl.BlockSpec((tc, H_in, W_in), lambda i: (i, 0, 0)),
                pl.BlockSpec((W_in, W_out), lambda i: (0, 0)),
                pl.BlockSpec((H_out, H_in), lambda i: (0, 0)),
            ],
            out_specs=pl.BlockSpec((tc, H_out, W_out), lambda i: (i, 0, 0)),
        ),
        compiler_params=pltpu.CompilerParams(
            dimension_semantics=("parallel",)),
    )(x3, wxT, wy)

    return out[:P].reshape(N, C, H_out, W_out)


class Interpolate:
    """JAX/Pallas equivalent of the PyTorch Interpolate module."""

    def __init__(self, size, mode="bilinear", align_corners=False):
        assert mode == "bilinear" and not align_corners, \
            "this kernel implements mode='bilinear', align_corners=False"
        self.size = tuple(size)

    def __call__(self, x):
        return interpolate_bilinear(x, self.size)


if __name__ == "__main__":
    key = jax.random.PRNGKey(0)
    N, C, H, W = 2, 4, 16, 16
    out_size = (32, 32)

    x = jax.random.normal(key, (N, C, H, W), dtype=jnp.float32)

    module = Interpolate(size=out_size, mode="bilinear", align_corners=False)
    y = jax.block_until_ready(module(x))

    assert y.shape == (N, C, out_size[0], out_size[1]), y.shape
    assert y.dtype == x.dtype

    # Reference: half-pixel-center bilinear upsampling (matches PyTorch
    # align_corners=False for upsampling).
    ref = jax.image.resize(x, (N, C, out_size[0], out_size[1]), method="bilinear")
    np.testing.assert_allclose(np.asarray(y), np.asarray(ref), rtol=1e-5, atol=1e-5)

    print("KERNEL_OK")
</pallas_src>

<mosaic_0001>
module attributes {stable_mosaic.version = 11 : i64} {
  func.func @kernel(%arg0: i32, %arg1: memref<4x16x16xf32, #tpu.memory_space<vmem>>, %arg2: memref<16x32xf32, #tpu.memory_space<vmem>>, %arg3: memref<32x16xf32, #tpu.memory_space<vmem>>, %arg4: memref<4x32x32xf32, #tpu.memory_space<vmem>>) attributes {dimension_semantics = [#tpu.dimension_semantics<parallel>], iteration_bounds = array<i64: 2>, scalar_prefetch = 0 : i64, scratch_operands = 0 : i64, tpu.core_type = #tpu.core_type<tc>, window_params = [{transform_indices = @transform_0, window_bounds = array<i64: 4, 16, 16>}, {pipeline_mode = #tpu.pipeline_mode<synchronous>, transform_indices = @transform_1, window_bounds = array<i64: 16, 32>}, {pipeline_mode = #tpu.pipeline_mode<synchronous>, transform_indices = @transform_2, window_bounds = array<i64: 32, 16>}, {transform_indices = @transform_3, window_bounds = array<i64: 4, 32, 32>}]} {
    %c0 = arith.constant 0 : index
    %c0_0 = arith.constant 0 : index
    %c0_1 = arith.constant 0 : index
    %0 = vector.load %arg1[%c0, %c0_0, %c0_1] : memref<4x16x16xf32, #tpu.memory_space<vmem>>, vector<4x16x16xf32>
    %1 = vector.shape_cast %0 : vector<4x16x16xf32> to vector<64x16xf32>
    %c0_2 = arith.constant 0 : index
    %c0_3 = arith.constant 0 : index
    %2 = vector.load %arg2[%c0_2, %c0_3] : memref<16x32xf32, #tpu.memory_space<vmem>>, vector<16x32xf32>
    %cst = arith.constant dense<0.000000e+00> : vector<64x32xf32>
    %3 = tpu.matmul %1, %2, %cst {dimension_numbers = #tpu.dot_dimension_numbers<[1], [0], [0], [1], [0, 0, 1, 1], [], []>} : vector<64x16xf32>, vector<16x32xf32>, vector<64x32xf32> -> vector<64x32xf32>
    %4 = vector.shape_cast %3 : vector<64x32xf32> to vector<4x16x32xf32>
    %c0_4 = arith.constant 0 : index
    %c0_5 = arith.constant 0 : index
    %5 = vector.load %arg3[%c0_4, %c0_5] : memref<32x16xf32, #tpu.memory_space<vmem>>, vector<32x16xf32>
    %6 = vector.shape_cast %5 : vector<32x16xf32> to vector<1x32x16xf32>
    %7 = vector.broadcast %6 : vector<1x32x16xf32> to vector<4x32x16xf32>
    "tpu.trace_start"() <{level = 10 : i32, message = "boh,bhw->bow"}> : () -> ()
    %cst_6 = arith.constant dense<0.000000e+00> : vector<4x32x32xf32>
    %8 = tpu.matmul %7, %4, %cst_6 {dimension_numbers = #tpu.dot_dimension_numbers<[2], [1], [1], [2], [0, 0, 0, 1, 1, 2], [0], [0]>} : vector<4x32x16xf32>, vector<4x16x32xf32>, vector<4x32x32xf32> -> vector<4x32x32xf32>
    "tpu.trace_stop"() : () -> ()
    %c0_7 = arith.constant 0 : index
    %c0_8 = arith.constant 0 : index
    %c0_9 = arith.constant 0 : index
    %9 = vector.load %arg4[%c0_7, %c0_8, %c0_9] : memref<4x32x32xf32, #tpu.memory_space<vmem>>, vector<4x32x32xf32>
    tpu.vector_store %arg4[%c0_7, %c0_8, %c0_9], %8 {strides = array<i32>} : memref<4x32x32xf32, #tpu.memory_space<vmem>>, vector<4x32x32xf32>,
    return
  }
  func.func @transform_0(%arg0: i32) -> (i32, i32, i32) {
    %c0_i32 = arith.constant 0 : i32
    %c0_i32_0 = arith.constant 0 : i32
    %c0_i32_1 = arith.constant 0 : i32
    return %arg0, %c0_i32, %c0_i32_0 : i32, i32, i32
  }
  func.func @transform_1(%arg0: i32) -> (i32, i32) {
    %c0_i32 = arith.constant 0 : i32
    %c0_i32_0 = arith.constant 0 : i32
    %c0_i32_1 = arith.constant 0 : i32
    return %c0_i32, %c0_i32_0 : i32, i32
  }
  func.func @transform_2(%arg0: i32) -> (i32, i32) {
    %c0_i32 = arith.constant 0 : i32
    %c0_i32_0 = arith.constant 0 : i32
    %c0_i32_1 = arith.constant 0 : i32
    return %c0_i32, %c0_i32_0 : i32, i32
  }
  func.func @transform_3(%arg0: i32) -> (i32, i32, i32) {
    %c0_i32 = arith.constant 0 : i32
    %c0_i32_0 = arith.constant 0 : i32
    %c0_i32_1 = arith.constant 0 : i32
    return %arg0, %c0_i32, %c0_i32_0 : i32, i32, i32
  }
}

</mosaic_0001>

<bundles_post_ra>
// kernel: interpolate_bilinear.1
= control target key start
LH: loop header
LB: loop body
LE: loop exit
PB: predicated region body
PF: predicated region fallthrough
CT: control target
= control target key end

     0   :  { %8 = vsyncpa [#allocation3], 0  ;;  %s1361_s0 = inlined_call_operand.hbm [shape: f32[8,16,16], index: 0, kind: input, shape index: {}]   ;;  %s1362_s1 = inlined_call_operand.vmem [shape: f32[16,32], index: 1, kind: input, shape index: {}]   ;;  %s1363_s2 = inlined_call_operand.vmem [shape: f32[32,16], index: 2, kind: input, shape index: {}]   ;;  %s1364_s3 = inlined_call_operand.hbm [shape: f32[8,32,32], index: 3, kind: output, shape index: {}]  }
   0x1   :  { %10 = vsyncpa [#allocation3 + $0x1], 0 }
   0x2   :  { %11 = vsyncpa [#allocation4], 0 }
   0x3   :  { %13 = vsyncpa [#allocation4 + $0x1], 0  ;;  %s1121_s12 = smov 0   ;;  %s1123_s13 = smov 0  }
   0x4   :  { %s1125_s14 = smov 0   ;;  %s1127_s15 = smov 0  }
   0x5 LB: > { %s1142_s16 = sadd.s32 4294967295, %s1093_s15   ;;  %s793_s17 = sadd.s32 4294967294, %s1093_s15   ;;  %s1093_s15 = sphi %s1127_s15, %s1377_s15   ;;  %s1089_s14 = sphi %s1125_s14, %s1376_s14   ;;  %s1085_s13 = sphi %s1123_s13, %s1375_s13   ;;  %s1081_s12 = sphi %s1121_s12, %s1374_s12  }
   0x6   : > { %s1146_s18 = sadd.s32 1, %s1093_s15   ;;  %s26_s19 = sadd.s32 1, %s1089_s14 }
   0x7   : > { %s23_s20 = ssub.s32 %s1093_s15, %s1146_s18  ;;  %p33_p0 = scmp.ne.s32.totalorder %s1089_s14, %s1085_s13 }
   0x8   : > { %p24_p1 = scmp.eq.s32.totalorder %s23_s20, 0  ;;  %p34_p2 = scmp.eq.s32.totalorder %s1093_s15, 0 }
   0x9   : > { %p39_p3 = scmp.ne.s32.totalorder %s1085_s13, %s1081_s12  ;;  %p40_p4 = scmp.eq.s32.totalorder %s1142_s16, 0 }
   0xa   : > { %s1158_s21 = scalar_select %p24_p1, %s1089_s14, %s26_s19  }
   0xb   : > { %p1160_p5 = por %p34_p2, %p33_p0  ;;  %p1164_p6 = por %p40_p4, %p39_p3 }
   0xc   : > { %p105_p7 = scmp.eq.s32.totalorder %s1142_s16, 1  ;;  %p111_p8 = scmp.eq.s32.totalorder %s793_s17, 1 }
   0xd   : > { %p959_p10 = scmp.lt.s32.totalorder %s1093_s15, 2  ;;  %s137_s26 = sand.u32 1, %s1089_s14  }
   0xe   : > { %p1171_p11 = por %p105_p7, %p33_p0  ;;  %p1175_p12 = por %p111_p8, %p39_p3 }
   0xf   : > { %s834_s27 = sshll.u32 %s1093_s15, 10  ;;  %s796_s28 = sshll.u32 %s137_s26, 6 }
  0x10   : > { %s1368_s24 = scalar_select %p1171_p11, 1, 0 }
  0x11   : > { %s1369_s25 = scalar_select %p1175_p12, 1, 0 }
  0x12   : > { %s1184_s4 = scalar_lea.hbm %s1361_s0, %s834_s27  ;;  %s141_s5 = scalar_lea.vmem [#allocation2], %s796_s28 }
  0x13   : > { %s149_s6 = sshll.u32 %s141_s5, 4  ;;  %p1188_p13 = pnand %p959_p10, %p1160_p5  ;;  %s1192_s6 = int_to_ptr.vmem [resolvable:$true] %s149_s6 }
  0x14   : > { %s1194_s8 = scalar_lea.sflag [#allocation3], %s137_s26  ;;  %s997_s9 = scalar_lea.hbm %s1184_s4, 1024 }
  0x15   : > { %p998_p0 = scmp.ne.s32.totalorder %s1184_s4, %s997_s9  ;;  %p999_p1 = pneg %p1188_p13 }
  0x16   : > { %s1002_s17 = scalar_lea.hbm %s1361_s0, 2048  ;;  %p1003_p4 = scmp.lt.u32.totalorder %s1184_s4, %s1361_s0 }
  0x17   : > { %p1000_p2 = pnand %p999_p1, %p998_p0  ;;  %p1004_p5 = scmp.lt.u32.totalorder %s1002_s17, %s997_s9 }
  0x18   : > { %p1006_p8 = scmp.lt.u32.totalorder %s997_s9, %s1184_s4 }
  0x19   : > { %p1001_p3 = pneg %p1000_p2  ;;  %p1005_p7 = por %p1004_p5, %p1003_p4 }
  0x1b   : > { %p1007_p10 = por %p1006_p8, %p1005_p7 }
  0x1d   : > { %p1008_p9 = pnand %p1007_p10, %p1001_p3 }
  0x1f   : > { %1011 = shalt.err (!%p1008_p9)
}
  0x20   : > { %s1012_s22 = scalar_lea.vmem %s1192_s6, 1024  ;;  %s1095_s26 = smov [#allocation2]  }
  0x21   : > { %p1013_p0 = scmp.ne.s32.totalorder %s1192_s6, %s1012_s22  ;;  %s1017_s27 = sshll.u32 %s1095_s26, 4  ;;  %s1018_s27 = int_to_ptr.vmem [resolvable:$false] %s1017_s27 }
  0x22   : > { %s1019_s28 = scalar_lea.vmem %s1018_s27, 2048  ;;  %p1020_p11 = scmp.lt.s32.totalorder %s1192_s6, %s1018_s27 }
  0x23   : > { %p1015_p2 = pnand %p1013_p0, %p999_p1  ;;  %p1021_p4 = scmp.lt.s32.totalorder %s1019_s28, %s1012_s22 }
  0x25   : > { %p1016_p12 = pneg %p1015_p2  ;;  %p1022_p5 = por %p1021_p4, %p1020_p11 }
  0x27   : > { %p1023_p7 = pnand %p1022_p5, %p1016_p12 }
  0x29   : > { %1026 = shalt.err (!%p1023_p7)
}
  0x2a   : > { %s1096_s29 = smov 128   ;;  %s1097_s30 = smov 8  }
  0x2b   : > { %954 = dma.hbm_to_vmem [thread:$0]  (!%p1188_p13), %s1184_s4, 1024, %s1192_s6, %s1194_s8, %s1096_s29, %s1096_s29, %s1097_s30  }
  0x2c   : > { %p800_p9 = scmp.ge.s32.totalorder %s1093_s15, 1  ;;  %p157_p1 = scmp.lt.s32.totalorder %s1093_s15, 3 }
  0x2e   : > { %p158_p3 = pnand %p800_p9, %p157_p1 }
  0x2f   : > { %s1225_s5 = sand.u32 (!%p158_p3), 1, %s1085_s13  }
  0x30   : > { %161 = sbr.rel (%p158_p3) target bundleno = 530 (0x212), region = 32  ;;  %s801_s9 = sshll.u32 (!%p158_p3), %s1225_s5, 6 }
  0x31   : > { %s164_s10 = scalar_lea.sflag (!%p158_p3), [#allocation3], %s1225_s5  ;;  %s167_s11 = scalar_lea.vmem (!%p158_p3), [#allocation2], %s801_s9 }
  0x37   : > { %1072 = dma.done.wait (%p1164_p6), %s164_s10, 1024  }
  0x38   : > { %1074 = vsyncadd (%p1164_p6), %s164_s10, 4294966272  ;;  %vm202_vm0 = vcmask 130048   ;;  %v200_v0 = vld [vmem:[%s1362_s1] sm:$0xff]  ;;  %v201_v1 = vld [vmem:[%s1362_s1 + $0x8] sm:$0xff]  ;;  %s802_s29 = sshll.u32 %s1225_s5, 7  ;;  %vm688_vm1 = vcmask 261120  }
  0x39   : > { %v192_v2 = vld [vmem:[%s167_s11] sm:$0xff]  ;;  %v927_v3 = vpack.c.bf16 %v201_v1, %v200_v0  ;;  %v193_v4 = vld [vmem:[%s167_s11 + $0x8] sm:$0xff]  ;;  %v194_v5 = vld [vmem:[%s167_s11 + $0x10] sm:$0xff]  ;;  %s1276_s30 = scalar_lea.vmem [#allocation5], %s802_s29  ;;  %s836_s9 = sshll.u32 %s1142_s16, 11 }
  0x3a   : > { %875 = vmatprep.mubr.msk.f32.mxu0 %vm202_vm0, %v192_v2  ;;  %v195_v6 = vld [vmem:[%s167_s11 + $0x18] sm:$0xff]  ;;  %v196_v7 = vld [vmem:[%s167_s11 + $0x20] sm:$0xff]  ;;  %v197_v8 = vld [vmem:[%s167_s11 + $0x28] sm:$0xff]  ;;  %s720_s10 = sshll.u32 %s1276_s30, 4  ;;  %s1311_s6 = scalar_lea.hbm %s1364_s3, %s836_s9  ;;  %s1313_s10 = int_to_ptr.vmem [resolvable:$true] %s720_s10 }
  0x3b   : > { %928 = vmatprep.subr.bf16.mxu0 %v927_v3  ;;  %v198_v9 = vld [vmem:[%s167_s11 + $0x30] sm:$0xff]  ;;  %v199_v10 = vld [vmem:[%s167_s11 + $0x38] sm:$0xff]  ;;  %v332_v11 = vld [vmem:[%s1363_s2] sm:$0xff]  ;;  %s706_s16 = scalar_lea.sflag [#allocation4], %s1225_s5  ;;  %s1027_s7 = scalar_lea.vmem %s1313_s10, 2048 }
  0x3c   : > { %930 = vmatpush3.bf16.msra.mxu0 %v927_v3  ;;  %891 = vmatprep.mubr.msk.f32.mxu1 %vm202_vm0, %v332_v11  ;;  %v333_v17 = vld [vmem:[%s1363_s2 + $0x8] sm:$0xff]  ;;  %v334_v19 = vld [vmem:[%s1363_s2 + $0x10] sm:$0xff]  ;;  %v335_v22 = vld [vmem:[%s1363_s2 + $0x18] sm:$0xff]  ;;  %p1028_p6 = scmp.ne.s32.totalorder %s1313_s10, %s1027_s7  ;;  %p1371_p11 = scmp.ne.s32.totalorder %s1368_s24, 0 }
  0x3d   : > { %s1098_s8 = smov [#allocation5]  }
  0x3e   : > { %p1029_p12 = pnand %p1028_p6, %p1371_p11  ;;  %s1031_s23 = sshll.u32 %s1098_s8, 4  ;;  %s1032_s23 = int_to_ptr.vmem [resolvable:$false] %s1031_s23 }
  0x3f   : > { %876 = vmatmul.mubr.msk.f32.vlgmr.msra.gmra.mrb[0].mxu0 %vm202_vm0, %v193_v4  ;;  %s1033_s17 = scalar_lea.vmem %s1032_s23, 4096  ;;  %p1034_p8 = scmp.lt.s32.totalorder %s1313_s10, %s1032_s23 }
  0x40   : > { %878 = vmatprep.mubr.msk.f32.mxu0 %vm202_vm0, %v194_v5  ;;  %p1030_p13 = pneg %p1029_p12  ;;  %p1035_p10 = scmp.lt.s32.totalorder %s1033_s17, %s1027_s7 }
  0x42   : > { %p1036_p0 = por %p1035_p10, %p1034_p8 }
  0x43   : > { %879 = vmatmul.mubr.msk.f32.gmra.mrb[2].mxu0 %vm202_vm0, %v195_v6 }
  0x44   : > { %881 = vmatprep.mubr.msk.f32.mxu0 %vm202_vm0, %v196_v7  ;;  %p1037_p2 = pnand %p1036_p0, %p1030_p13 }
  0x47   : > { %882 = vmatmul.mubr.msk.f32.gmra.mrb[4].mxu0 %vm202_vm0, %v197_v8 }
  0x48   : > { %884 = vmatprep.mubr.msk.f32.mxu0 %vm202_vm0, %v198_v9 }
  0x4b   : > { %885 = vmatmul.mubr.msk.f32.gmra.mrb[6].mxu0 %vm202_vm0, %v199_v10 }
  0x4c   : > { %911 = vmatprep.mubr.msk.f32.mxu0 %vm202_vm0, %v332_v11 }
 0x112   : > { %v877_v12 = vpop.f32.mrb[0].mxu0 }
 0x113   : > { %v293_v13 = vpop.f32.mrb[1].mxu0 }
 0x114   : > { %v931_v14 = vpack.c.bf16 %v877_v12, %v293_v13 }
 0x116   : > { %v880_v15 = vpop.f32.mrb[2].mxu0  ;;  %932 = vmatprep.subr.bf16.mxu1 %v931_v14 }
 0x117   : > { %v303_v16 = vpop.f32.mrb[3].mxu0  ;;  %934 = vmatpush3.bf16.msra.mxu1 %v931_v14 }
 0x118   : > { %v935_v18 = vpack.c.bf16 %v880_v15, %v303_v16 }
 0x11a   : > { %v883_v20 = vpop.f32.mrb[4].mxu0  ;;  %936 = vmatprep.subr.bf16.mxu1 %v935_v18  ;;  %892 = vmatmul.mubr.msk.f32.vlgmr.msra.gmra.mrb[0].mxu1 %vm202_vm0, %v333_v17 }
 0x11b   : > { %v313_v21 = vpop.f32.mrb[5].mxu0  ;;  %938 = vmatpush3.bf16.msra.mxu1 %v935_v18  ;;  %894 = vmatprep.mubr.msk.f32.mxu1 %vm202_vm0, %v334_v19 }
 0x11c   : > { %v939_v23 = vpack.c.bf16 %v883_v20, %v313_v21 }
 0x11e   : > { %940 = vmatprep.subr.bf16.mxu0 %v939_v23  ;;  %v886_v24 = vpop.f32.mrb[6].mxu0  ;;  %895 = vmatmul.mubr.msk.f32.gmra.mrb[2].mxu1 %vm202_vm0, %v335_v22 }
 0x11f   : > { %942 = vmatpush3.bf16.msra.mxu0 %v939_v23  ;;  %v323_v25 = vpop.f32.mrb[7].mxu0  ;;  %901 = vmatprep.mubr.msk.f32.mxu1 %vm202_vm0, %v332_v11 }
 0x120   : > { %v943_v26 = vpack.c.bf16 %v886_v24, %v323_v25 }
 0x122   : > { %944 = vmatprep.subr.bf16.mxu1 %v943_v26  ;;  %902 = vmatmul.mubr.msk.f32.vlgmr.msra.gmra.mrb[4].mxu1 %vm202_vm0, %v333_v17 }
 0x123   : > { %946 = vmatpush3.bf16.msra.mxu1 %v943_v26  ;;  %904 = vmatprep.mubr.msk.f32.mxu1 %vm202_vm0, %v334_v19 }
 0x124   : > { %912 = vmatmul.mubr.msk.f32.vlgmr.msra.gmra.mrb[8].mxu0 %vm202_vm0, %v333_v17 }
 0x125   : > { %914 = vmatprep.mubr.msk.f32.mxu0 %vm202_vm0, %v334_v19 }
 0x126   : > { %905 = vmatmul.mubr.msk.f32.gmra.mrb[6].mxu1 %vm202_vm0, %v335_v22 }
 0x127   : > { %921 = vmatprep.mubr.msk.f32.mxu1 %vm202_vm0, %v332_v11 }
 0x128   : > { %915 = vmatmul.mubr.msk.f32.gmra.mrb[10].mxu0 %vm202_vm0, %v335_v22 }
 0x12a   : > { %922 = vmatmul.mubr.msk.f32.vlgmr.msra.gmra.mrb[8].mxu1 %vm202_vm0, %v333_v17 }
 0x12b   : > { %924 = vmatprep.mubr.msk.f32.mxu1 %vm202_vm0, %v334_v19 }
 0x12e   : > { %925 = vmatmul.mubr.msk.f32.gmra.mrb[10].mxu1 %vm202_vm0, %v335_v22 }
 0x1ed   : > { %v893_v27 = vpop.f32.mrb[0].mxu1 }
 0x1ee   : > { %690 = vst.msk [vmem:[%s1276_s30 + $0x8] sm:$0xff] %vm688_vm1, %v893_v27  ;;  %v414_v28 = vpop.f32.mrb[1].mxu1 }
 0x1ef   : > { %689 = vst.msk [vmem:[%s1276_s30] sm:$0xff] %vm688_vm1, %v414_v28 }
 0x1f1   : > { %v896_v29 = vpop.f32.mrb[2].mxu1 }
 0x1f2   : > { %692 = vst.msk [vmem:[%s1276_s30 + $0x18] sm:$0xff] %vm688_vm1, %v896_v29  ;;  %v424_v30 = vpop.f32.mrb[3].mxu1 }
 0x1f3   : > { %691 = vst.msk [vmem:[%s1276_s30 + $0x10] sm:$0xff] %vm688_vm1, %v424_v30 }
 0x1f5   : > { %v903_v31 = vpop.f32.mrb[4].mxu1 }
 0x1f6   : > { %694 = vst.msk [vmem:[%s1276_s30 + $0x28] sm:$0xff] %vm688_vm1, %v903_v31  ;;  %v499_v32 = vpop.f32.mrb[5].mxu1 }
 0x1f7   : > { %693 = vst.msk [vmem:[%s1276_s30 + $0x20] sm:$0xff] %vm688_vm1, %v499_v32  ;;  %v913_v33 = vpop.f32.mrb[8].mxu0 }
 0x1f8   : > { %698 = vst.msk [vmem:[%s1276_s30 + $0x48] sm:$0xff] %vm688_vm1, %v913_v33  ;;  %v584_v34 = vpop.f32.mrb[9].mxu0 }
 0x1f9   : > { %v906_v35 = vpop.f32.mrb[6].mxu1  ;;  %697 = vst.msk [vmem:[%s1276_s30 + $0x40] sm:$0xff] %vm688_vm1, %v584_v34 }
 0x1fa   : > { %696 = vst.msk [vmem:[%s1276_s30 + $0x38] sm:$0xff] %vm688_vm1, %v906_v35  ;;  %v509_v36 = vpop.f32.mrb[7].mxu1 }
 0x1fb   : > { %695 = vst.msk [vmem:[%s1276_s30 + $0x30] sm:$0xff] %vm688_vm1, %v509_v36  ;;  %v916_v37 = vpop.f32.mrb[10].mxu0 }
 0x1fc   : > { %700 = vst.msk [vmem:[%s1276_s30 + $0x58] sm:$0xff] %vm688_vm1, %v916_v37  ;;  %v594_v38 = vpop.f32.mrb[11].mxu0 }
 0x1fd   : > { %v923_v39 = vpop.f32.mrb[8].mxu1  ;;  %699 = vst.msk [vmem:[%s1276_s30 + $0x50] sm:$0xff] %vm688_vm1, %v594_v38 }
 0x1fe   : > { %702 = vst.msk [vmem:[%s1276_s30 + $0x68] sm:$0xff] %vm688_vm1, %v923_v39  ;;  %v669_v40 = vpop.f32.mrb[9].mxu1 }
 0x1ff   : > { %701 = vst.msk [vmem:[%s1276_s30 + $0x60] sm:$0xff] %vm688_vm1, %v669_v40 }
 0x201   : > { %v926_v41 = vpop.f32.mrb[10].mxu1 }
 0x202   : > { %704 = vst.msk [vmem:[%s1276_s30 + $0x78] sm:$0xff] %vm688_vm1, %v926_v41  ;;  %v679_v42 = vpop.f32.mrb[11].mxu1 }
 0x203   : > { %703 = vst.msk [vmem:[%s1276_s30 + $0x70] sm:$0xff] %vm688_vm1, %v679_v42 }
 0x204   : > { %1040 = shalt.err (!%p1037_p2)
}
 0x205   : > { %s1041_s19 = scalar_lea.hbm %s1311_s6, 2048  ;;  %s1045_s26 = scalar_lea.hbm %s1364_s3, 4096 }
 0x206   : > { %p1042_p4 = scmp.ne.s32.totalorder %s1311_s6, %s1041_s19  ;;  %p1046_p9 = scmp.lt.u32.totalorder %s1311_s6, %s1364_s3 }
 0x207   : > { %p1047_p1 = scmp.lt.u32.totalorder %s1045_s26, %s1041_s19  ;;  %p1049_p6 = scmp.lt.u32.totalorder %s1041_s19, %s1311_s6 }
 0x208   : > { %p1043_p5 = pnand %p1042_p4, %p1371_p11 }
 0x209   : > { %p1048_p3 = por %p1047_p1, %p1046_p9 }
 0x20a   : > { %p1044_p7 = pneg %p1043_p5 }
 0x20b   : > { %p1050_p12 = por %p1049_p6, %p1048_p3 }
 0x20d   : > { %p1051_p13 = pnand %p1050_p12, %p1044_p7 }
 0x20f   : > { %1054 = shalt.err (!%p1051_p13)
}
 0x210   : > { %s1099_s29 = smov 128   ;;  %s1100_s30 = smov 8  }
 0x211   : > { %949 = dma.vmem_to_hbm [thread:$0]  (%p1371_p11), %s1313_s10, 2048, %s1311_s6, %s706_s16, %s1099_s29, %s1099_s29, %s1100_s30  }
 0x212 PF: > { %s735_s9 = sand.u32 1, %s1081_s12   ;;  %p1372_p8 = scmp.ne.s32.totalorder %s1369_s25, 0 }
 0x213   : > { %p1373_p10 = scmp.ge.s32.totalorder %s1093_s15, 2  ;;  %s736_s11 = scalar_lea.sflag [#allocation4], %s735_s9 }
 0x215   : > { %p956_p0 = pnand %p1373_p10, %p1372_p8 }
 0x217   : > { %1076 = dma.done.wait (!%p956_p0), %s736_s11, 2048  }
 0x218   : > { %1078 = vsyncadd (!%p956_p0), %s736_s11, 4294965248  ;;  %p16_p2 = scmp.ge.s32.totalorder %s1146_s18, 4   ;;  %s1374_s12 = smov %s1085_s13 }
 0x219   : > { %s1375_s13 = smov %s1089_s14  ;;  %s1376_s14 = smov %s1158_s21 }
 0x21a   : > { %s1377_s15 = smov %s1146_s18  ;;  %18 = sbr.rel (!%p16_p2) target bundleno = 5 (0x5), region = 77 }
 0x221   :  { %741 = vsyncpa [#allocation3], 1 }
 0x222   :  { %743 = vsyncpa [#allocation3 + $0x1], 1 }
 0x223   :  { %744 = vsyncpa [#allocation4], 1 }
 0x224   :  { %746 = vsyncpa [#allocation4 + $0x1], 1 }

</bundles_post_ra>
